<compile_context>
chip_gen: v5e
topology: v5e:2x2
jax: 0.10.0
libtpu: 0.0.40
codegen_flags: <defaults>
</compile_context>

<pallas_src>
import functools

import jax
import jax.numpy as jnp
from jax.experimental import pallas as pl
from jax.experimental.pallas import tpu as pltpu


def _round_up(v, m):
    return ((v + m - 1) // m) * m


def _tpu_vmem_capacity():
    try:
        return int(pltpu.get_tpu_info().vmem_capacity_bytes)
    except Exception:
        return 0


def _vmem_defaults():
    """(vmem_limit_bytes, tile_rows) per TPU generation."""
    cap = _tpu_vmem_capacity()
    if cap == 0:
        return 48 * 1024 * 1024, 256                 # unknown -> conservative
    if cap <= 80 * 1024 * 1024:                      # v7x-class: 64 MiB / TC
        return 48 * 1024 * 1024, 256
    return 112 * 1024 * 1024, 512                    # v5e / v6e: 128 MiB


def _adagnn_kernel(lamb, inv_n, tm, hp,
                   inv_msum_ref,
                   a_ref, xw1_ref, w2_ref, b1_ref, b2_ref,
                   wh1_ref, bh1_ref, wt2_ref, bt2_ref, wc2_ref, bc2_ref,
                   ts_oh_ref, nd_oh_ref,
                   out_ref,
                   hw2_ref, acc_ref):
    """grid axis 0: layer pass (0: HW2 = relu(Â·XW1+b1)@W2, 1: Z = Â·HW2+b2 + heads)
       grid axis 1: row tile of Â / HW2 / Z."""
    layer = pl.program_id(0)
    i = pl.program_id(1)
    n_tiles = pl.num_programs(1)
    row0 = pl.multiple_of(i * tm, tm)
    f32 = jnp.float32

    a_blk = a_ref[...]                                   # (TM, NP) bf16

    @pl.when(jnp.logical_and(layer == 0, i == 0))
    def _():
        acc_ref[0] = 0.0
        acc_ref[1] = 0.0

    # ---- pass 0: per-tile  hw2_blk = relu(Â_blk @ XW1 + b1) @ W2  (bf16) ----
    @pl.when(layer == 0)
    def _():
        h = jnp.dot(a_blk, xw1_ref[...], preferred_element_type=f32)
        h = jnp.maximum(h + b1_ref[...], 0.0)
        hw2 = jnp.dot(h.astype(w2_ref.dtype), w2_ref[...],
                      preferred_element_type=f32)
        hw2_ref[pl.ds(row0, tm), :] = hw2.astype(hw2_ref.dtype)

    # ---- pass 1: Z row block, packed MLP heads, per-row CE, accumulation ----
    @pl.when(layer == 1)
    def _():
        z = jnp.dot(a_blk, hw2_ref[...], preferred_element_type=f32)
        z = (z + b2_ref[...]).astype(wh1_ref.dtype)

        # packed first head layer: [wt1 | wc1]  (ReverseGradient fwd == id)
        h1 = jnp.dot(z, wh1_ref[...], preferred_element_type=f32)
        h1 = jnp.maximum(h1 + bh1_ref[...], 0.0).astype(wt2_ref.dtype)
        t = h1[:, :hp]
        c = h1[:, hp:]

        ts = jnp.dot(t, wt2_ref[...], preferred_element_type=f32) + bt2_ref[...]
        preds = jnp.dot(c, wc2_ref[...], preferred_element_type=f32) + bc2_ref[...]

        def ce_rows(logits, onehot):
            # padded logit lanes carry a -1e30 bias -> exp() underflows to 0;
            # per-row validity is recovered from the one-hot itself, so padded
            # rows and (for cls) unmasked rows contribute exactly 0.
            m = jnp.max(logits, axis=-1, keepdims=True)
            lse = m + jnp.log(jnp.sum(jnp.exp(logits - m), axis=-1, keepdims=True))
            valid = jnp.sum(onehot, axis=-1, keepdims=True)
            tgt = jnp.sum(onehot * logits, axis=-1, keepdims=True)
            return valid * lse - tgt                     # (TM, 1)

        ts_rows = ce_rows(ts, ts_oh_ref[...].astype(f32))
        cls_rows = ce_rows(preds, nd_oh_ref[...].astype(f32))
        acc_ref[0] = acc_ref[0] + jnp.sum(cls_rows)
        acc_ref[1] = acc_ref[1] + jnp.sum(ts_rows)

        @pl.when(i == n_tiles - 1)
        def _():
            out_ref[0] = acc_ref[0] * inv_msum_ref[0]
            out_ref[1] = lamb * acc_ref[1] * inv_n


def build_normalized_adjacency(edge_index, num_nodes):
    """Dense GCN normalization: Â = D^{-1/2}(A + I)D^{-1/2}, A[dst, src] = 1.

    NOTE: if edge_index already carries self-loops, min(A,1)+I puts 2.0 on the
    diagonal (kept consistent with the prior reference semantics).
    """
    src = edge_index[0]
    dst = edge_index[1]
    a = jnp.zeros((num_nodes, num_nodes), jnp.float32).at[dst, src].add(1.0)
    a = jnp.minimum(a, 1.0) + jnp.eye(num_nodes, dtype=jnp.float32)
    deg = jnp.sum(a, axis=1)
    dinv = jax.lax.rsqrt(deg)
    return a * dinv[:, None] * dinv[None, :]


def adagnn_forward(params, x, edge_index, ts_target, node_target, node_mask,
                   lamb=1.0, tile_rows=None, adj_dtype=jnp.bfloat16,
                   vmem_limit_bytes=None):
    """Returns (classification_loss, lamb * ts_loss), matching AdaGNN.forward.

    node_target is length N (aligned with nodes); only entries where node_mask
    is True contribute — equivalent to preds[node_mask] vs target.
    """
    n, in_dim = x.shape
    hidden = params["w1"].shape[1]
    ts_out = params["wt2"].shape[1]
    n_cls = params["wc2"].shape[1]
    f32 = jnp.float32
    bf16 = jnp.bfloat16

    vmem_default, tile_default = _vmem_defaults()
    if vmem_limit_bytes is None:
        vmem_limit_bytes = vmem_default
    if tile_rows is None:
        tile_rows = tile_default

    # Row tile: sublane-packed for the adjacency dtype (16 for bf16, 8 for f32).
    pack = 16 if jnp.dtype(adj_dtype).itemsize < 4 else 8
    tm = max(pack, _round_up(min(tile_rows, _round_up(n, pack)), pack))
    np_ = _round_up(n, tm)
    n_tiles = np_ // tm

    hp = _round_up(hidden, 128)
    ts_p = _round_up(ts_out, 128)
    c_p = _round_up(n_cls, 128)

    def pad2(a, r, c, fill=0.0):
        return jnp.pad(a.astype(f32), ((0, r - a.shape[0]), (0, c - a.shape[1])),
                       constant_values=fill)

    def pad_bias(v, c, fill=0.0):
        return jnp.pad(v.astype(f32).reshape(1, -1), ((0, 0), (0, c - v.shape[0])),
                       constant_values=fill)

    # Â: build, cast to streaming dtype, then pad (no padded-f32 HBM copy).
    a_hat = build_normalized_adjacency(edge_index, n).astype(adj_dtype)
    a_pad = jnp.pad(a_hat, ((0, np_ - n), (0, np_ - n)))

    # XW1 hoisted to XLA as a bf16 matmul (f32 accumulation), resident in VMEM.
    xw1 = jnp.dot(x.astype(bf16), params["w1"].astype(bf16),
                  preferred_element_type=f32)
    xw1 = pad2(xw1, np_, hp).astype(bf16)

    b1 = pad_bias(params["b1"], hp)
    w2 = pad2(params["w2"], hp, hp).astype(bf16)
    b2 = pad_bias(params["b2"], hp)

    # Packed head first layer: [wt1 | wc1], [bt1 | bc1].
    wh1 = jnp.concatenate([pad2(params["wt1"], hp, hp),
                           pad2(params["wc1"], hp, hp)], axis=1).astype(bf16)
    bh1 = jnp.concatenate([pad_bias(params["bt1"], hp),
                           pad_bias(params["bc1"], hp)], axis=1)

    # output-head biases: padded lanes get -1e30 so the CE logsumexp ignores them
    wt2 = pad2(params["wt2"], hp, ts_p).astype(bf16)
    bt2 = pad_bias(params["bt2"], ts_p, fill=-1e30)
    wc2 = pad2(params["wc2"], hp, c_p).astype(bf16)
    bc2 = pad_bias(params["bc2"], c_p, fill=-1e30)

    # One-hots (bf16): nd_oh pre-masked by node_mask; padded rows are all-zero,
    # so the in-kernel sum(onehot) mask handles both padding and masking.
    mask_f = node_mask.astype(f32)
    ts_oh = pad2(jax.nn.one_hot(ts_target, ts_out, dtype=f32), np_, ts_p).astype(bf16)
    nd_oh = pad2(jax.nn.one_hot(node_target, n_cls, dtype=f32) * mask_f[:, None],
                 np_, c_p).astype(bf16)

    # 1/sum(mask) precomputed once (and guarded against an empty mask).
    inv_msum = (1.0 / jnp.maximum(jnp.sum(mask_f), 1.0)).reshape(1)

    smem = pl.BlockSpec(memory_space=pltpu.MemorySpace.SMEM)

    def full_block(arr):
        nd = arr.ndim

        def imap(l, i, _nd=nd):
            return (0,) * _nd

        return pl.BlockSpec(arr.shape, imap)

    def oh_block(cols):
        # block (i,0) during pass 1, constant block 0 during pass 0 (no re-DMA).
        return pl.BlockSpec((tm, cols), lambda l, i: (i * l, 0))

    in_specs = [
        smem,                                             # inv_msum (SMEM scalar)
        pl.BlockSpec((tm, np_), lambda l, i: (i, 0)),     # Â row block (streamed)
        full_block(xw1),                                  # XW1 (resident bf16)
        full_block(w2), full_block(b1), full_block(b2),
        full_block(wh1), full_block(bh1),
        full_block(wt2), full_block(bt2),
        full_block(wc2), full_block(bc2),
        oh_block(ts_p), oh_block(c_p),
    ]

    grid_spec = pltpu.PrefetchScalarGridSpec(
        num_scalar_prefetch=0,
        grid=(2, n_tiles),                                # (layer pass, row tile)
        in_specs=in_specs,
        out_specs=smem,
        scratch_shapes=[
            pltpu.VMEM((np_, hp), bf16),                  # HW2, persists across passes
            pltpu.SMEM((2,), f32),                        # [sum cls CE, sum ts CE]
        ],
    )

    out = pl.pallas_call(
        functools.partial(_adagnn_kernel, float(lamb), 1.0 / float(n), tm, hp),
        out_shape=jax.ShapeDtypeStruct((2,), f32),
        grid_spec=grid_spec,
        compiler_params=pltpu.CompilerParams(
            # row tiles feed shared accumulators and pass 1 depends on every
            # pass-0 tile through the HW2 scratch -> both axes sequential.
            dimension_semantics=("arbitrary", "arbitrary"),
            vmem_limit_bytes=vmem_limit_bytes,
        ),
    )(inv_msum, a_pad, xw1,
      w2, b1, b2, wh1, bh1, wt2, bt2, wc2, bc2,
      ts_oh, nd_oh)
    return out[0], out[1]


def adagnn_reference(params, x, edge_index, ts_target, node_target, node_mask,
                     lamb=1.0):
    """Pure-f32 JAX reference mirroring the PyTorch AdaGNN forward."""
    n = x.shape[0]
    a = build_normalized_adjacency(edge_index, n)
    h = jax.nn.relu(a @ (x @ params["w1"]) + params["b1"])
    z = a @ (h @ params["w2"]) + params["b2"]
    ts = jax.nn.relu(z @ params["wt1"] + params["bt1"]) @ params["wt2"] + params["bt2"]
    preds = jax.nn.relu(z @ params["wc1"] + params["bc1"]) @ params["wc2"] + params["bc2"]

    def ce(logits, target):
        lse = jax.nn.logsumexp(logits, axis=-1)
        picked = jnp.take_along_axis(logits, target[:, None], axis=-1)[:, 0]
        return lse - picked

    ts_loss = jnp.mean(ce(ts, ts_target))
    m = node_mask.astype(jnp.float32)
    cls_loss = jnp.sum(m * ce(preds, node_target)) / jnp.maximum(jnp.sum(m), 1.0)
    return cls_loss, lamb * ts_loss


def init_params(key, in_dim, hidden, ts_out=5, n_cls=2, scale=0.1):
    keys = jax.random.split(key, 12)
    p = {}
    p["w1"] = scale * jax.random.normal(keys[0], (in_dim, hidden), jnp.float32)
    p["b1"] = scale * jax.random.normal(keys[1], (hidden,), jnp.float32)
    p["w2"] = scale * jax.random.normal(keys[2], (hidden, hidden), jnp.float32)
    p["b2"] = scale * jax.random.normal(keys[3], (hidden,), jnp.float32)
    p["wt1"] = scale * jax.random.normal(keys[4], (hidden, hidden), jnp.float32)
    p["bt1"] = scale * jax.random.normal(keys[5], (hidden,), jnp.float32)
    p["wt2"] = scale * jax.random.normal(keys[6], (hidden, ts_out), jnp.float32)
    p["bt2"] = scale * jax.random.normal(keys[7], (ts_out,), jnp.float32)
    p["wc1"] = scale * jax.random.normal(keys[8], (hidden, hidden), jnp.float32)
    p["bc1"] = scale * jax.random.normal(keys[9], (hidden,), jnp.float32)
    p["wc2"] = scale * jax.random.normal(keys[10], (hidden, n_cls), jnp.float32)
    p["bc2"] = scale * jax.random.normal(keys[11], (n_cls,), jnp.float32)
    return p


if __name__ == "__main__":
    N, IN_DIM, HIDDEN, TS_OUT, LAMB = 64, 8, 32, 5, 1.0

    key = jax.random.PRNGKey(0)
    k_param, k_x, k_ts, k_node = jax.random.split(key, 4)

    params = init_params(k_param, IN_DIM, HIDDEN, ts_out=TS_OUT)
    x = jax.random.normal(k_x, (N, IN_DIM), jnp.float32)

    # Undirected ring graph as edge_index (2, E)
    ids = jnp.arange(N, dtype=jnp.int32)
    nbr = (ids + 1) % N
    edge_index = jnp.stack(
        [jnp.concatenate([ids, nbr]), jnp.concatenate([nbr, ids])], axis=0
    )

    ts_target = jax.random.randint(k_ts, (N,), 0, TS_OUT, dtype=jnp.int32)
    node_target = jax.random.randint(k_node, (N,), 0, 2, dtype=jnp.int32)
    node_mask = (ids % 2) == 0  # half the nodes labeled

    # tile_rows=16 -> 4 row tiles x 2 layer passes: exercises the grid,
    # scratch persistence and cross-tile loss accumulation.
    cls_loss, ts_loss = adagnn_forward(
        params, x, edge_index, ts_target, node_target, node_mask,
        lamb=LAMB, tile_rows=16
    )
    cls_loss = jax.block_until_ready(cls_loss)
    ts_loss = jax.block_until_ready(ts_loss)

    ref_cls, ref_ts = adagnn_reference(
        params, x, edge_index, ts_target, node_target, node_mask, lamb=LAMB
    )

    # Â / XW1 / HW2 / weights are bf16 (f32 MXU accumulation), so allow a small
    # tolerance against the all-f32 reference.
    assert jnp.allclose(cls_loss, ref_cls, atol=2e-2, rtol=2e-2), (cls_loss, ref_cls)
    assert jnp.allclose(ts_loss, ref_ts, atol=2e-2, rtol=2e-2), (ts_loss, ref_ts)

    print("KERNEL_OK")
</pallas_src>

<mosaic_0001>
module attributes {stable_mosaic.version = 11 : i64} {
  func.func @_adagnn_kernel(%arg0: i32, %arg1: i32, %arg2: memref<1xf32, #tpu.memory_space<smem>>, %arg3: memref<16x64xbf16, #tpu.memory_space<vmem>>, %arg4: memref<64x128xbf16, #tpu.memory_space<vmem>>, %arg5: memref<128x128xbf16, #tpu.memory_space<vmem>>, %arg6: memref<1x128xf32, #tpu.memory_space<vmem>>, %arg7: memref<1x128xf32, #tpu.memory_space<vmem>>, %arg8: memref<128x256xbf16, #tpu.memory_space<vmem>>, %arg9: memref<1x256xf32, #tpu.memory_space<vmem>>, %arg10: memref<128x128xbf16, #tpu.memory_space<vmem>>, %arg11: memref<1x128xf32, #tpu.memory_space<vmem>>, %arg12: memref<128x128xbf16, #tpu.memory_space<vmem>>, %arg13: memref<1x128xf32, #tpu.memory_space<vmem>>, %arg14: memref<16x128xbf16, #tpu.memory_space<vmem>>, %arg15: memref<16x128xbf16, #tpu.memory_space<vmem>>, %arg16: memref<2xf32, #tpu.memory_space<smem>>, %arg17: memref<64x128xbf16, #tpu.memory_space<vmem>>, %arg18: memref<2xf32, #tpu.memory_space<smem>>) attributes {dimension_semantics = [#tpu.dimension_semantics<arbitrary>, #tpu.dimension_semantics<arbitrary>], iteration_bounds = array<i64: 2, 4>, scalar_prefetch = 0 : i64, scratch_operands = 2 : i64, tpu.core_type = #tpu.core_type<tc>, window_params = [{transform_indices = @transform_0, window_bounds = array<i64: 1>}, {transform_indices = @transform_1, window_bounds = array<i64: 16, 64>}, {pipeline_mode = #tpu.pipeline_mode<synchronous>, transform_indices = @transform_2, window_bounds = array<i64: 64, 128>}, {pipeline_mode = #tpu.pipeline_mode<synchronous>, transform_indices = @transform_3, window_bounds = array<i64: 128, 128>}, {pipeline_mode = #tpu.pipeline_mode<synchronous>, transform_indices = @transform_4, window_bounds = array<i64: 1, 128>}, {pipeline_mode = #tpu.pipeline_mode<synchronous>, transform_indices = @transform_5, window_bounds = array<i64: 1, 128>}, {pipeline_mode = #tpu.pipeline_mode<synchronous>, transform_indices = @transform_6, window_bounds = array<i64: 128, 256>}, {pipeline_mode = #tpu.pipeline_mode<synchronous>, transform_indices = @transform_7, window_bounds = array<i64: 1, 256>}, {pipeline_mode = #tpu.pipeline_mode<synchronous>, transform_indices = @transform_8, window_bounds = array<i64: 128, 128>}, {pipeline_mode = #tpu.pipeline_mode<synchronous>, transform_indices = @transform_9, window_bounds = array<i64: 1, 128>}, {pipeline_mode = #tpu.pipeline_mode<synchronous>, transform_indices = @transform_10, window_bounds = array<i64: 128, 128>}, {pipeline_mode = #tpu.pipeline_mode<synchronous>, transform_indices = @transform_11, window_bounds = array<i64: 1, 128>}, {transform_indices = @transform_12, window_bounds = array<i64: 16, 128>}, {transform_indices = @transform_13, window_bounds = array<i64: 16, 128>}, {transform_indices = @transform_14, window_bounds = array<i64: 2>}]} {
    %c16_i32 = arith.constant 16 : i32
    %0 = arith.muli %arg1, %c16_i32 : i32
    %1 = tpu.assume_multiple %0, 16 : i32
    %c0 = arith.constant 0 : index
    %c0_0 = arith.constant 0 : index
    %2 = vector.load %arg3[%c0, %c0_0] : memref<16x64xbf16, #tpu.memory_space<vmem>>, vector<16x64xbf16>
    %c0_i32 = arith.constant 0 : i32
    %3 = arith.cmpi eq, %arg0, %c0_i32 : i32
    %c0_i32_1 = arith.constant 0 : i32
    %4 = arith.cmpi eq, %arg1, %c0_i32_1 : i32
    %5 = arith.andi %3, %4 : i1
    %6 = arith.extui %5 : i1 to i32
    %c0_i32_2 = arith.constant 0 : i32
    %7 = arith.cmpi ne, %6, %c0_i32_2 : i32
    scf.if %7 {
      %cst = arith.constant 0.000000e+00 : f32
      %c0_6 = arith.constant 0 : index
      %14 = memref.load %arg18[%c0_6] : memref<2xf32, #tpu.memory_space<smem>>
      memref.store %cst, %arg18[%c0_6] : memref<2xf32, #tpu.memory_space<smem>>
      %cst_7 = arith.constant 0.000000e+00 : f32
      %c1 = arith.constant 1 : index
      %15 = memref.load %arg18[%c1] : memref<2xf32, #tpu.memory_space<smem>>
      memref.store %cst_7, %arg18[%c1] : memref<2xf32, #tpu.memory_space<smem>>
    } else {
    }
    %c0_i32_3 = arith.constant 0 : i32
    %8 = arith.cmpi eq, %arg0, %c0_i32_3 : i32
    %9 = arith.extui %8 : i1 to i32
    %c0_i32_4 = arith.constant 0 : i32
    %10 = arith.cmpi ne, %9, %c0_i32_4 : i32
    scf.if %10 {
      %c0_6 = arith.constant 0 : index
      %c0_7 = arith.constant 0 : index
      %14 = vector.load %arg4[%c0_6, %c0_7] : memref<64x128xbf16, #tpu.memory_space<vmem>>, vector<64x128xbf16>
      %cst = arith.constant dense<0.000000e+00> : vector<16x128xf32>
      %15 = tpu.matmul %2, %14, %cst {dimension_numbers = #tpu.dot_dimension_numbers<[1], [0], [0], [1], [0, 0, 1, 1], [], []>} : vector<16x64xbf16>, vector<64x128xbf16>, vector<16x128xf32> -> vector<16x128xf32>
      %c0_8 = arith.constant 0 : index
      %c0_9 = arith.constant 0 : index
      %16 = vector.load %arg6[%c0_8, %c0_9] : memref<1x128xf32, #tpu.memory_space<vmem>>, vector<1x128xf32>
      %17 = vector.broadcast %16 : vector<1x128xf32> to vector<16x128xf32>
      %18 = arith.addf %15, %17 : vector<16x128xf32>
      %cst_10 = arith.constant 0.000000e+00 : f32
      %19 = vector.broadcast %cst_10 : f32 to vector<16x128xf32>
      %20 = arith.maximumf %18, %19 : vector<16x128xf32>
      %21 = arith.truncf %20 : vector<16x128xf32> to vector<16x128xbf16>
      %c0_11 = arith.constant 0 : index
      %c0_12 = arith.constant 0 : index
      %22 = vector.load %arg5[%c0_11, %c0_12] : memref<128x128xbf16, #tpu.memory_space<vmem>>, vector<128x128xbf16>
      %cst_13 = arith.constant dense<0.000000e+00> : vector<16x128xf32>
      %23 = tpu.matmul %21, %22, %cst_13 {dimension_numbers = #tpu.dot_dimension_numbers<[1], [0], [0], [1], [0, 0, 1, 1], [], []>} : vector<16x128xbf16>, vector<128x128xbf16>, vector<16x128xf32> -> vector<16x128xf32>
      %24 = arith.truncf %23 : vector<16x128xf32> to vector<16x128xbf16>
      %25 = arith.index_cast %1 : i32 to index
      %c0_14 = arith.constant 0 : index
      %26 = vector.load %arg17[%25, %c0_14] : memref<64x128xbf16, #tpu.memory_space<vmem>>, vector<16x128xbf16>
      tpu.vector_store %arg17[%25, %c0_14], %24 {strides = array<i32>} : memref<64x128xbf16, #tpu.memory_space<vmem>>, vector<16x128xbf16>,
    } else {
    }
    %c1_i32 = arith.constant 1 : i32
    %11 = arith.cmpi eq, %arg0, %c1_i32 : i32
    %12 = arith.extui %11 : i1 to i32
    %c0_i32_5 = arith.constant 0 : i32
    %13 = arith.cmpi ne, %12, %c0_i32_5 : i32
    scf.if %13 {
      %c0_6 = arith.constant 0 : index
      %c0_7 = arith.constant 0 : index
      %14 = vector.load %arg17[%c0_6, %c0_7] : memref<64x128xbf16, #tpu.memory_space<vmem>>, vector<64x128xbf16>
      %cst = arith.constant dense<0.000000e+00> : vector<16x128xf32>
      %15 = tpu.matmul %2, %14, %cst {dimension_numbers = #tpu.dot_dimension_numbers<[1], [0], [0], [1], [0, 0, 1, 1], [], []>} : vector<16x64xbf16>, vector<64x128xbf16>, vector<16x128xf32> -> vector<16x128xf32>
      %c0_8 = arith.constant 0 : index
      %c0_9 = arith.constant 0 : index
      %16 = vector.load %arg7[%c0_8, %c0_9] : memref<1x128xf32, #tpu.memory_space<vmem>>, vector<1x128xf32>
      %17 = vector.broadcast %16 : vector<1x128xf32> to vector<16x128xf32>
      %18 = arith.addf %15, %17 : vector<16x128xf32>
      %19 = arith.truncf %18 : vector<16x128xf32> to vector<16x128xbf16>
      %c0_10 = arith.constant 0 : index
      %c0_11 = arith.constant 0 : index
      %20 = vector.load %arg8[%c0_10, %c0_11] : memref<128x256xbf16, #tpu.memory_space<vmem>>, vector<128x256xbf16>
      %cst_12 = arith.constant dense<0.000000e+00> : vector<16x256xf32>
      %21 = tpu.matmul %19, %20, %cst_12 {dimension_numbers = #tpu.dot_dimension_numbers<[1], [0], [0], [1], [0, 0, 1, 1], [], []>} : vector<16x128xbf16>, vector<128x256xbf16>, vector<16x256xf32> -> vector<16x256xf32>
      %c0_13 = arith.constant 0 : index
      %c0_14 = arith.constant 0 : index
      %22 = vector.load %arg9[%c0_13, %c0_14] : memref<1x256xf32, #tpu.memory_space<vmem>>, vector<1x256xf32>
      %23 = vector.broadcast %22 : vector<1x256xf32> to vector<16x256xf32>
      %24 = arith.addf %21, %23 : vector<16x256xf32>
      %cst_15 = arith.constant 0.000000e+00 : f32
      %25 = vector.broadcast %cst_15 : f32 to vector<16x256xf32>
      %26 = arith.maximumf %24, %25 : vector<16x256xf32>
      %27 = arith.truncf %26 : vector<16x256xf32> to vector<16x256xbf16>
      %28 = vector.extract_strided_slice %27 {offsets = [0, 0], sizes = [16, 128], strides = [1, 1]} : vector<16x256xbf16> to vector<16x128xbf16>
      %29 = vector.extract_strided_slice %27 {offsets = [0, 128], sizes = [16, 128], strides = [1, 1]} : vector<16x256xbf16> to vector<16x128xbf16>
      %c0_16 = arith.constant 0 : index
      %c0_17 = arith.constant 0 : index
      %30 = vector.load %arg10[%c0_16, %c0_17] : memref<128x128xbf16, #tpu.memory_space<vmem>>, vector<128x128xbf16>
      %cst_18 = arith.constant dense<0.000000e+00> : vector<16x128xf32>
      %31 = tpu.matmul %28, %30, %cst_18 {dimension_numbers = #tpu.dot_dimension_numbers<[1], [0], [0], [1], [0, 0, 1, 1], [], []>} : vector<16x128xbf16>, vector<128x128xbf16>, vector<16x128xf32> -> vector<16x128xf32>
      %c0_19 = arith.constant 0 : index
      %c0_20 = arith.constant 0 : index
      %32 = vector.load %arg11[%c0_19, %c0_20] : memref<1x128xf32, #tpu.memory_space<vmem>>, vector<1x128xf32>
      %33 = vector.broadcast %32 : vector<1x128xf32> to vector<16x128xf32>
      %34 = arith.addf %31, %33 : vector<16x128xf32>
      %c0_21 = arith.constant 0 : index
      %c0_22 = arith.constant 0 : index
      %35 = vector.load %arg12[%c0_21, %c0_22] : memref<128x128xbf16, #tpu.memory_space<vmem>>, vector<128x128xbf16>
      %cst_23 = arith.constant dense<0.000000e+00> : vector<16x128xf32>
      %36 = tpu.matmul %29, %35, %cst_23 {dimension_numbers = #tpu.dot_dimension_numbers<[1], [0], [0], [1], [0, 0, 1, 1], [], []>} : vector<16x128xbf16>, vector<128x128xbf16>, vector<16x128xf32> -> vector<16x128xf32>
      %c0_24 = arith.constant 0 : index
      %c0_25 = arith.constant 0 : index
      %37 = vector.load %arg13[%c0_24, %c0_25] : memref<1x128xf32, #tpu.memory_space<vmem>>, vector<1x128xf32>
      %38 = vector.broadcast %37 : vector<1x128xf32> to vector<16x128xf32>
      %39 = arith.addf %36, %38 : vector<16x128xf32>
      %c0_26 = arith.constant 0 : index
      %c0_27 = arith.constant 0 : index
      %40 = vector.load %arg14[%c0_26, %c0_27] : memref<16x128xbf16, #tpu.memory_space<vmem>>, vector<16x128xbf16>
      %41 = arith.extf %40 : vector<16x128xbf16> to vector<16x128xf32>
      %cst_28 = arith.constant dense<0xFF800000> : vector<16xf32>
      %42 = vector.multi_reduction <maximumf>, %34, %cst_28 [1] : vector<16x128xf32> to vector<16xf32>
      %43 = vector.shape_cast %42 : vector<16xf32> to vector<16x1xf32>
      %44 = vector.broadcast %43 : vector<16x1xf32> to vector<16x128xf32>
      %45 = arith.subf %34, %44 : vector<16x128xf32>
      %46 = math.exp %45 : vector<16x128xf32>
      %cst_29 = arith.constant dense<0.000000e+00> : vector<16xf32>
      %47 = vector.multi_reduction <add>, %46, %cst_29 [1] : vector<16x128xf32> to vector<16xf32>
      %48 = vector.shape_cast %47 : vector<16xf32> to vector<16x1xf32>
      %49 = math.log %48 : vector<16x1xf32>
      %50 = arith.addf %43, %49 : vector<16x1xf32>
      %cst_30 = arith.constant dense<0.000000e+00> : vector<16xf32>
      %51 = vector.multi_reduction <add>, %41, %cst_30 [1] : vector<16x128xf32> to vector<16xf32>
      %52 = vector.shape_cast %51 : vector<16xf32> to vector<16x1xf32>
      %53 = arith.mulf %41, %34 : vector<16x128xf32>
      %cst_31 = arith.constant dense<0.000000e+00> : vector<16xf32>
      %54 = vector.multi_reduction <add>, %53, %cst_31 [1] : vector<16x128xf32> to vector<16xf32>
      %55 = vector.shape_cast %54 : vector<16xf32> to vector<16x1xf32>
      %56 = arith.mulf %52, %50 : vector<16x1xf32>
      %57 = arith.subf %56, %55 : vector<16x1xf32>
      %c0_32 = arith.constant 0 : index
      %c0_33 = arith.constant 0 : index
      %58 = vector.load %arg15[%c0_32, %c0_33] : memref<16x128xbf16, #tpu.memory_space<vmem>>, vector<16x128xbf16>
      %59 = arith.extf %58 : vector<16x128xbf16> to vector<16x128xf32>
      %cst_34 = arith.constant dense<0xFF800000> : vector<16xf32>
      %60 = vector.multi_reduction <maximumf>, %39, %cst_34 [1] : vector<16x128xf32> to vector<16xf32>
      %61 = vector.shape_cast %60 : vector<16xf32> to vector<16x1xf32>
      %62 = vector.broadcast %61 : vector<16x1xf32> to vector<16x128xf32>
      %63 = arith.subf %39, %62 : vector<16x128xf32>
      %64 = math.exp %63 : vector<16x128xf32>
      %cst_35 = arith.constant dense<0.000000e+00> : vector<16xf32>
      %65 = vector.multi_reduction <add>, %64, %cst_35 [1] : vector<16x128xf32> to vector<16xf32>
      %66 = vector.shape_cast %65 : vector<16xf32> to vector<16x1xf32>
      %67 = math.log %66 : vector<16x1xf32>
      %68 = arith.addf %61, %67 : vector<16x1xf32>
      %cst_36 = arith.constant dense<0.000000e+00> : vector<16xf32>
      %69 = vector.multi_reduction <add>, %59, %cst_36 [1] : vector<16x128xf32> to vector<16xf32>
      %70 = vector.shape_cast %69 : vector<16xf32> to vector<16x1xf32>
      %71 = arith.mulf %59, %39 : vector<16x128xf32>
      %cst_37 = arith.constant dense<0.000000e+00> : vector<16xf32>
      %72 = vector.multi_reduction <add>, %71, %cst_37 [1] : vector<16x128xf32> to vector<16xf32>
      %73 = vector.shape_cast %72 : vector<16xf32> to vector<16x1xf32>
      %74 = arith.mulf %70, %68 : vector<16x1xf32>
      %75 = arith.subf %74, %73 : vector<16x1xf32>
      %c0_38 = arith.constant 0 : index
      %76 = memref.load %arg18[%c0_38] : memref<2xf32, #tpu.memory_space<smem>>
      %77 = vector.shape_cast %75 : vector<16x1xf32> to vector<1x16x1xf32>
      %cst_39 = arith.constant dense<0.000000e+00> : vector<1xf32>
      %78 = vector.multi_reduction <add>, %77, %cst_39 [1, 2] : vector<1x16x1xf32> to vector<1xf32>
      %79 = vector.shape_cast %78 : vector<1xf32> to vector<1x1x1xf32>
      %80 = vector.extract %79[0, 0, 0] : f32 from vector<1x1x1xf32>
      %81 = arith.addf %76, %80 : f32
      %c0_40 = arith.constant 0 : index
      %82 = memref.load %arg18[%c0_40] : memref<2xf32, #tpu.memory_space<smem>>
      memref.store %81, %arg18[%c0_40] : memref<2xf32, #tpu.memory_space<smem>>
      %c1 = arith.constant 1 : index
      %83 = memref.load %arg18[%c1] : memref<2xf32, #tpu.memory_space<smem>>
      %84 = vector.shape_cast %57 : vector<16x1xf32> to vector<1x16x1xf32>
      %cst_41 = arith.constant dense<0.000000e+00> : vector<1xf32>
      %85 = vector.multi_reduction <add>, %84, %cst_41 [1, 2] : vector<1x16x1xf32> to vector<1xf32>
      %86 = vector.shape_cast %85 : vector<1xf32> to vector<1x1x1xf32>
      %87 = vector.extract %86[0, 0, 0] : f32 from vector<1x1x1xf32>
      %88 = arith.addf %83, %87 : f32
      %c1_42 = arith.constant 1 : index
      %89 = memref.load %arg18[%c1_42] : memref<2xf32, #tpu.memory_space<smem>>
      memref.store %88, %arg18[%c1_42] : memref<2xf32, #tpu.memory_space<smem>>
      %c3_i32 = arith.constant 3 : i32
      %90 = arith.cmpi eq, %arg1, %c3_i32 : i32
      %91 = arith.extui %90 : i1 to i32
      %c0_i32_43 = arith.constant 0 : i32
      %92 = arith.cmpi ne, %91, %c0_i32_43 : i32
      scf.if %92 {
        %c0_44 = arith.constant 0 : index
        %93 = memref.load %arg18[%c0_44] : memref<2xf32, #tpu.memory_space<smem>>
        %c0_45 = arith.constant 0 : index
        %94 = memref.load %arg2[%c0_45] : memref<1xf32, #tpu.memory_space<smem>>
        %95 = arith.mulf %93, %94 : f32
        %c0_46 = arith.constant 0 : index
        %96 = memref.load %arg16[%c0_46] : memref<2xf32, #tpu.memory_space<smem>>
        memref.store %95, %arg16[%c0_46] : memref<2xf32, #tpu.memory_space<smem>>
        %c1_47 = arith.constant 1 : index
        %97 = memref.load %arg18[%c1_47] : memref<2xf32, #tpu.memory_space<smem>>
        %cst_48 = arith.constant 1.000000e+00 : f32
        %98 = arith.mulf %cst_48, %97 : f32
        %cst_49 = arith.constant 1.562500e-02 : f32
        %99 = arith.mulf %98, %cst_49 : f32
        %c1_50 = arith.constant 1 : index
        %100 = memref.load %arg16[%c1_50] : memref<2xf32, #tpu.memory_space<smem>>
        memref.store %99, %arg16[%c1_50] : memref<2xf32, #tpu.memory_space<smem>>
      } else {
      }
    } else {
    }
    return
  }
  func.func @transform_0(%arg0: i32, %arg1: i32) -> i32 {
    %c0_i32 = arith.constant 0 : i32
    %c0_i32_0 = arith.constant 0 : i32
    return %c0_i32 : i32
  }
  func.func @transform_1(%arg0: i32, %arg1: i32) -> (i32, i32) {
    %c0_i32 = arith.constant 0 : i32
    %c0_i32_0 = arith.constant 0 : i32
    return %arg1, %c0_i32 : i32, i32
  }
  func.func @transform_2(%arg0: i32, %arg1: i32) -> (i32, i32) {
    %c0_i32 = arith.constant 0 : i32
    %c0_i32_0 = arith.constant 0 : i32
    %c0_i32_1 = arith.constant 0 : i32
    return %c0_i32, %c0_i32_0 : i32, i32
  }
  func.func @transform_3(%arg0: i32, %arg1: i32) -> (i32, i32) {
    %c0_i32 = arith.constant 0 : i32
    %c0_i32_0 = arith.constant 0 : i32
    %c0_i32_1 = arith.constant 0 : i32
    return %c0_i32, %c0_i32_0 : i32, i32
  }
  func.func @transform_4(%arg0: i32, %arg1: i32) -> (i32, i32) {
    %c0_i32 = arith.constant 0 : i32
    %c0_i32_0 = arith.constant 0 : i32
    %c0_i32_1 = arith.constant 0 : i32
    return %c0_i32, %c0_i32_0 : i32, i32
  }
  func.func @transform_5(%arg0: i32, %arg1: i32) -> (i32, i32) {
    %c0_i32 = arith.constant 0 : i32
    %c0_i32_0 = arith.constant 0 : i32
    %c0_i32_1 = arith.constant 0 : i32
    return %c0_i32, %c0_i32_0 : i32, i32
  }
  func.func @transform_6(%arg0: i32, %arg1: i32) -> (i32, i32) {
    %c0_i32 = arith.constant 0 : i32
    %c0_i32_0 = arith.constant 0 : i32
    %c0_i32_1 = arith.constant 0 : i32
    return %c0_i32, %c0_i32_0 : i32, i32
  }
  func.func @transform_7(%arg0: i32, %arg1: i32) -> (i32, i32) {
    %c0_i32 = arith.constant 0 : i32
    %c0_i32_0 = arith.constant 0 : i32
    %c0_i32_1 = arith.constant 0 : i32
    return %c0_i32, %c0_i32_0 : i32, i32
  }
  func.func @transform_8(%arg0: i32, %arg1: i32) -> (i32, i32) {
    %c0_i32 = arith.constant 0 : i32
    %c0_i32_0 = arith.constant 0 : i32
    %c0_i32_1 = arith.constant 0 : i32
    return %c0_i32, %c0_i32_0 : i32, i32
  }
  func.func @transform_9(%arg0: i32, %arg1: i32) -> (i32, i32) {
    %c0_i32 = arith.constant 0 : i32
    %c0_i32_0 = arith.constant 0 : i32
    %c0_i32_1 = arith.constant 0 : i32
    return %c0_i32, %c0_i32_0 : i32, i32
  }
  func.func @transform_10(%arg0: i32, %arg1: i32) -> (i32, i32) {
    %c0_i32 = arith.constant 0 : i32
    %c0_i32_0 = arith.constant 0 : i32
    %c0_i32_1 = arith.constant 0 : i32
    return %c0_i32, %c0_i32_0 : i32, i32
  }
  func.func @transform_11(%arg0: i32, %arg1: i32) -> (i32, i32) {
    %c0_i32 = arith.constant 0 : i32
    %c0_i32_0 = arith.constant 0 : i32
    %c0_i32_1 = arith.constant 0 : i32
    return %c0_i32, %c0_i32_0 : i32, i32
  }
  func.func @transform_12(%arg0: i32, %arg1: i32) -> (i32, i32) {
    %0 = arith.muli %arg1, %arg0 : i32
    %c0_i32 = arith.constant 0 : i32
    %c0_i32_0 = arith.constant 0 : i32
    return %0, %c0_i32 : i32, i32
  }
  func.func @transform_13(%arg0: i32, %arg1: i32) -> (i32, i32) {
    %0 = arith.muli %arg1, %arg0 : i32
    %c0_i32 = arith.constant 0 : i32
    %c0_i32_0 = arith.constant 0 : i32
    return %0, %c0_i32 : i32, i32
  }
  func.func @transform_14(%arg0: i32, %arg1: i32) -> i32 {
    %c0_i32 = arith.constant 0 : i32
    %c0_i32_0 = arith.constant 0 : i32
    return %c0_i32 : i32
  }
}

</mosaic_0001>

<bundles_post_ra>
// kernel: tpu_custom_call.1
= control target key start
LH: loop header
LB: loop body
LE: loop exit
PB: predicated region body
PF: predicated region fallthrough
CT: control target
= control target key end

     0   :  { %s2769_s0 = inlined_call_operand.<no memory space> [shape: f32[1], index: 0, kind: input, shape index: {}]   ;;  %s2770_s1 = inlined_call_operand.hbm [shape: bf16[64,64], index: 1, kind: input, shape index: {}]   ;;  %s2771_s2 = inlined_call_operand.hbm [shape: bf16[64,128], index: 2, kind: input, shape index: {}]   ;;  %s2772_s3 = inlined_call_operand.hbm [shape: bf16[128,128], index: 3, kind: input, shape index: {}]   ;;  %s2773_s4 = inlined_call_operand.vmem [shape: f32[1,128], index: 4, kind: input, shape index: {}]   ;;  %s2774_s5 = inlined_call_operand.vmem [shape: f32[1,128], index: 5, kind: input, shape index: {}]   ;;  %s2775_s6 = inlined_call_operand.hbm [shape: bf16[128,256], index: 6, kind: input, shape index: {}]   ;;  %s2776_s7 = inlined_call_operand.vmem [shape: f32[1,256], index: 7, kind: input, shape index: {}]   ;;  %s2777_s8 = inlined_call_operand.hbm [shape: bf16[128,128], index: 8, kind: input, shape index: {}]   ;;  %s2778_s9 = inlined_call_operand.vmem [shape: f32[1,128], index: 9, kind: input, shape index: {}]   ;;  %s2779_s10 = inlined_call_operand.hbm [shape: bf16[128,128], index: 10, kind: input, shape index: {}]   ;;  %s2780_s11 = inlined_call_operand.vmem [shape: f32[1,128], index: 11, kind: input, shape index: {}]   ;;  %s2781_s12 = inlined_call_operand.hbm [shape: bf16[64,128], index: 12, kind: input, shape index: {}]   ;;  %s2782_s13 = inlined_call_operand.hbm [shape: bf16[64,128], index: 13, kind: input, shape index: {}]   ;;  %s2783_s14 = inlined_call_operand.hbm [shape: f32[2], index: 14, kind: output, shape index: {}]  }
   0x1   :  { %2795 = sst [smem:[#allocation32_spill]] %s2770_s1 }
   0x2   :  { %2796 = sst [smem:[#allocation33_spill]] %s2771_s2 }
   0x3   :  { %2797 = sst [smem:[#allocation34_spill]] %s2772_s3 }
   0x4   :  { %2798 = sst [smem:[#allocation35_spill]] %s2773_s4 }
   0x5   :  { %2799 = sst [smem:[#allocation36_spill]] %s2774_s5 }
   0x6   :  { %2800 = sst [smem:[#allocation37_spill]] %s2775_s6 }
   0x7   :  { %2801 = sst [smem:[#allocation38_spill]] %s2776_s7 }
   0x8   :  { %2802 = sst [smem:[#allocation39_spill]] %s2777_s8 }
   0x9   :  { %2803 = sst [smem:[#allocation40_spill]] %s2778_s9 }
   0xa   :  { %2804 = sst [smem:[#allocation41_spill]] %s2780_s11 }
   0xb   :  { %2805 = sst [smem:[#allocation42_spill]] %s2781_s12 }
   0xc   :  { %2806 = sst [smem:[#allocation43_spill]] %s2782_s13 }
   0xd   :  { %2807 = sst [smem:[#allocation44_spill]] %s2783_s14 }
   0xe   :  { %19 = sst [smem:[#allocation4]] %s2769_s0 }
   0xf   :  { %20 = vsyncpa [#allocation6], 0 }
  0x10   :  { %22 = vsyncpa [#allocation6 + $0x1], 0 }
  0x11   :  { %23 = vsyncpa [#allocation9], 0 }
  0x12   :  { %24 = vsyncpa [#allocation12], 0 }
  0x13   :  { %25 = vsyncpa [#allocation15], 0 }
  0x14   :  { %26 = vsyncpa [#allocation7], 0  ;;  %s2441_s15 = smov 0   ;;  %s2443_s16 = smov 0  }
  0x15   :  { %s2445_s17 = smov 0   ;;  %s2447_s18 = smov 0  }
  0x16   :  { %s2449_s19 = smov 0   ;;  %s2451_s20 = smov 0  }
  0x17   :  { %s2453_s21 = smov 0   ;;  %s2455_s0 = smov 0  }
  0x18   :  { %s2457_s22 = smov 0   ;;  %s2459_s23 = smov 0  }
  0x19   :  { %s2461_s24 = smov 0  }
  0x1a LB: > { %2808 = sst [smem:[#allocation25_spill]] %s2326_s19  ;;  %s2495_s25 = sadd.s32 4294967295, %s2350_s24   ;;  %s2350_s24 = sphi %s2461_s24, %s32_s24   ;;  %s2346_s23 = sphi %s2459_s23, %s2855_s23   ;;  %s2342_s22 = sphi %s2457_s22, %s2854_s22   ;;  %s2338_s0 = sphi %s2455_s0, %s2848_s0   ;;  %s2334_s21 = sphi %s2453_s21, %s2853_s21   ;;  %s2330_s20 = sphi %s2451_s20, %s2847_s20   ;;  %s2326_s19 = sphi %s2449_s19, %s2846_s19   ;;  %s2322_s18 = sphi %s2447_s18, %s2845_s18   ;;  %s2318_s17 = sphi %s2445_s17, %s2852_s17   ;;  %s2314_s16 = sphi %s2443_s16, %s2851_s16   ;;  %s2310_s15 = sphi %s2441_s15, %s2850_s15  }
  0x1b   : > { %2809 = sst [smem:[#allocation26_spill]] %s2330_s20  ;;  %s41_s26 = sadd.s32 1, %s2342_s22 }
  0x1c   : > { %2810 = sst [smem:[#allocation27_spill]] %s2334_s21  ;;  %p2498_p0 = scmp.ge.s32.totalorder %s41_s26, 4 }
  0x1d   : > { %2811 = sst [smem:[#allocation28_spill]] %s2338_s0  ;;  %s72_s28 = sadd.s32 1, %s2330_s20 }
  0x1e   : > { %2812 = sst [smem:[#allocation29_spill]] %s2346_s23  ;;  %p79_p1 = scmp.ne.s32.totalorder %s2330_s20, %s2326_s19 }
  0x1f   : > { %p80_p2 = scmp.eq.s32.totalorder %s2350_s24, 0  ;;  %s2857_s26 = smov (%p2498_p0, %s41_s26), 0 }
  0x20   : > { %p85_p4 = scmp.ne.s32.totalorder %s2326_s19, %s2322_s18  ;;  %s69_s30 = ssub.s32 %s2342_s22, %s2857_s26 }
  0x21   : > { %p2512_p3 = por %p80_p2, %p79_p1  ;;  %p86_p5 = scmp.eq.s32.totalorder %s2495_s25, 0 }
  0x22   : > { %p70_p6 = scmp.eq.s32.totalorder %s69_s30, 0  ;;  %p1858_p8 = scmp.lt.s32.totalorder %s2350_s24, 8 }
  0x23   : > { %p2522_p7 = por %p86_p5, %p85_p4  ;;  %s484_s11 = sand.u32 1, %s2350_s24  }
  0x24   : > { %s2527_s9 = scalar_select %p70_p6, %s2330_s20, %s72_s28  }
  0x25   : > { %s486_s7 = sand.u32 1, %s2330_s20   ;;  %s1721_s4 = sshll.u32 %s2342_s22, 3 }
  0x26   : > { %2816 = sst [smem:[#allocation30_spill]] %s2527_s9  ;;  %s1490_s5 = sshll.u32 %s486_s7, 3 }
  0x27   : > { %s2817_s1 = sld [smem:[#allocation32_spill]]  ;;  %s488_s30 = scalar_lea.vmem [#allocation5], %s1490_s5 }
  0x28   : > { %s496_s13 = sshll.u32 %s488_s30, 4  ;;  %p1844_p9 = pnand %p1858_p8, %p2512_p3  ;;  %s497_s13 = int_to_ptr.vmem [resolvable:$true] %s496_s13 }
  0x29   : > { %s2540_s28 = scalar_lea.sflag [#allocation6], %s484_s11  ;;  %s2788_s9 = smov 64  }
  0x2a   : > { %s2790_s20 = smov 4   ;;  %p1483_p10 = scmp.ge.s32.totalorder %s2350_s24, 1 }
  0x2b   : > { %p383_p11 = scmp.lt.s32.totalorder %s2350_s24, 9  ;;  %s2818_s2 = sld [smem:[#allocation33_spill]] }
  0x2c   : > { %s2354_s11 = smov [#allocation8]   ;;  %s2820_s6 = sld [smem:[#allocation37_spill]] }
  0x2d   : > { %s493_s0 = scalar_lea.hbm %s2817_s1, %s1721_s4  ;;  %p2551_p12 = pnand %p1483_p10, %p383_p11 }
  0x2e   : > { %s494_s19 = sshll.u32 %s493_s0, 4  ;;  %s399_s0 = sshll.u32 %s2354_s11, 4  ;;  %s495_s19 = int_to_ptr.hbm [resolvable:$true] %s494_s19  ;;  %s400_s0 = int_to_ptr.vmem [resolvable:$true] %s399_s0 }
  0x2f   : > { %1846 = dma.hbm_to_vmem [thread:$0]  (!%p1844_p9), %s495_s19, 128, %s497_s13, %s2540_s28, %s2788_s9, %s2788_s9, %s2790_s20  }
  0x30   : > { %p1827_p13 = pneg %p2551_p12  ;;  %s2355_s30 = smov [#allocation11]  }
  0x31   : > { %s397_s7 = sshll.u32 %s2818_s2, 4  ;;  %s433_s4 = sshll.u32 %s2355_s30, 4  ;;  %s398_s7 = int_to_ptr.hbm [resolvable:$true] %s397_s7  ;;  %s434_s4 = int_to_ptr.vmem [resolvable:$true] %s433_s4 }
  0x32   : > { %s431_s29 = sshll.u32 %s2820_s6, 4  ;;  %p2562_p1 = pnand %p1827_p13, %p86_p5  ;;  %s432_s29 = int_to_ptr.hbm [resolvable:$true] %s431_s29 }
  0x33   : > { %s2356_s5 = smov 128   ;;  %s2357_s11 = smov 8  }
  0x34   : > { %1830 = dma.hbm_to_vmem [thread:$0]  (!%p2562_p1), %s398_s7, 512, %s400_s0, [#allocation9], %s2788_s9, %s2788_s9, %s2790_s20  }
  0x35   : > { %1836 = dma.hbm_to_vmem [thread:$0]  (!%p2562_p1), %s432_s29, 2048, %s434_s4, [#allocation12], %s2356_s5, %s2356_s5, %s2357_s11  }
  0x36   : > { %s44_s13 = sadd.s32 1, %s2346_s23  ;;  %s2576_s19 = smul.u32 %s2342_s22, %s2346_s23 }
  0x37   : > { %s2859_s13 = smov (!%p2498_p0, %s44_s13), %s2346_s23  ;;  %s310_s30 = sadd.s32 1, %s2318_s17 }
  0x38   : > { %p317_p3 = scmp.ne.s32.totalorder %s2318_s17, %s2314_s16  ;;  %p46_p4 = scmp.ge.s32.totalorder %s2859_s13, 2 }
  0x39   : > { %p323_p6 = scmp.ne.s32.totalorder %s2314_s16, %s2310_s15  ;;  %s508_s0 = sand.u32 1, %s2318_s17  }
  0x3a   : > { %p2588_p9 = por %p317_p3, %p80_p2  ;;  %s2861_s13 = smov (%p46_p4, %s2859_s13), 0 }
  0x3b   : > { %2823 = sst [smem:[#allocation31_spill]] %s2861_s13  ;;  %p2597_p10 = por %p323_p6, %p86_p5 }
  0x3c   : > { %s2601_s29 = sshll.u32 %s508_s0, 3  ;;  %s306_s15 = smul.u32 %s2861_s13, %s2857_s26 }
  0x3d   : > { %s2794_s4 = sshll.u32 %s2576_s19, 3  ;;  %s510_s5 = scalar_lea.vmem [#allocation16], %s2601_s29 }
  0x3e   : > { %s519_s11 = sshll.u32 %s510_s5, 4  ;;  %s307_s9 = ssub.s32 %s2576_s19, %s306_s15  ;;  %s520_s11 = int_to_ptr.vmem [resolvable:$true] %s519_s11 }
  0x3f   : > { %s2825_s12 = sld [smem:[#allocation42_spill]]  ;;  %p308_p0 = scmp.eq.s32.totalorder %s307_s9, 0 }
  0x40   : > { %p2620_p2 = pnand %p1858_p8, %p2588_p9  ;;  %s2827_s3 = sld [smem:[#allocation34_spill]] }
  0x41   : > { %s2614_s23 = scalar_select %p308_p0, %s2318_s17, %s310_s30  }
  0x42   : > { %s2358_s1 = smov [#allocation10]   ;;  %s2828_s9 = smov 4  }
  0x43   : > { %s2829_s20 = smov 64   ;;  %s2830_s8 = sld [smem:[#allocation39_spill]] }
  0x44   : > { %s2359_s5 = smov [#allocation13]   ;;  %s2831_s7 = sshll.u32 %s2576_s19, 3 }
  0x45   : > { %s516_s2 = scalar_lea.hbm %s2825_s12, %s2794_s4  ;;  %s450_s15 = sshll.u32 %s2359_s5, 4  ;;  %s451_s15 = int_to_ptr.vmem [resolvable:$true] %s450_s15 }
  0x46   : > { %s517_s6 = sshll.u32 %s516_s2, 4  ;;  %s411_s13 = sshll.u32 %s2827_s3, 4  ;;  %s518_s6 = int_to_ptr.hbm [resolvable:$true] %s517_s6  ;;  %s412_s13 = int_to_ptr.hbm [resolvable:$true] %s411_s13 }
  0x47   : > { %s413_s2 = sshll.u32 %s2358_s1, 4  ;;  %s533_s3 = scalar_lea.vmem [#allocation17], %s2601_s29  ;;  %s414_s2 = int_to_ptr.vmem [resolvable:$true] %s413_s2 }
  0x48   : > { %1849 = dma.hbm_to_vmem [thread:$0]  (!%p2620_p2), %s518_s6, 128, %s520_s11, %s2540_s28, %s2829_s20, %s2829_s20, %s2828_s9  }
  0x49   : > { %s448_s4 = sshll.u32 %s2830_s8, 4  ;;  %s465_s6 = sshll.u32 %s2779_s10, 4  ;;  %s449_s4 = int_to_ptr.hbm [resolvable:$true] %s448_s4  ;;  %s466_s6 = int_to_ptr.hbm [resolvable:$true] %s465_s6 }
  0x4a   : > { %1833 = dma.hbm_to_vmem [thread:$0]  (!%p2562_p1), %s412_s13, 1024, %s414_s2, [#allocation9], %s2829_s20, %s2829_s20, %s2828_s9  }
  0x4b   : > { %1839 = dma.hbm_to_vmem [thread:$0]  (!%p2562_p1), %s449_s4, 1024, %s451_s15, [#allocation12], %s2829_s20, %s2829_s20, %s2828_s9  }
  0x4c   : > { %s2360_s11 = smov [#allocation14]   ;;  %s2832_s8 = sld [smem:[#allocation43_spill]] }
  0x4d   : > { %s467_s30 = sshll.u32 %s2360_s11, 4  ;;  %s542_s1 = sshll.u32 %s533_s3, 4  ;;  %s468_s30 = int_to_ptr.vmem [resolvable:$true] %s467_s30  ;;  %s543_s1 = int_to_ptr.vmem [resolvable:$true] %s542_s1 }
  0x4e   : > { %1842 = dma.hbm_to_vmem [thread:$0]  (!%p2562_p1), %s466_s6, 1024, %s468_s30, [#allocation15], %s2829_s20, %s2829_s20, %s2828_s9  }
  0x50   : > { %554 = sbr.rel (%p2551_p12) target bundleno = 1326 (0x52e), region = 76 }
  0x52   : > { %s539_s12 = scalar_lea.hbm %s2832_s8, %s2831_s7  ;;  %s2833_s8 = sld [smem:[#allocation25_spill]] (!%p2551_p12) }
  0x53   : > { %s540_s5 = sshll.u32 %s539_s12, 4  ;;  %s556_s12 = sand.u32 (!%p2551_p12), 1, %s2495_s25   ;;  %s541_s5 = int_to_ptr.hbm [resolvable:$true] %s540_s5 }
  0x54   : > { %1852 = dma.hbm_to_vmem [thread:$0]  (!%p2620_p2), %s541_s5, 128, %s543_s1, %s2540_s28, %s2829_s20, %s2829_s20, %s2828_s9  }
  0x55   : > { %s557_s4 = scalar_lea.sflag [#allocation6], %s556_s12 }
  0x58   : > { %s558_s18 = sand.u32 1, %s2833_s8  }
  0x59   : > { %s1500_s19 = sshll.u32 %s558_s18, 3 }
  0x5a   : > { %s560_s15 = scalar_lea.vmem [#allocation5], %s1500_s19 }
  0x5b   : > { %2285 = dma.done.wait (%p2522_p7), %s557_s4, 128  }
  0x5c   : > { %2287 = vsyncadd (%p2522_p7), %s557_s4, 4294967168 }
  0x5d   : > { %2289 = dma.done.wait (%p86_p5), [#allocation9], 1536  }
  0x5e   : > { %2291 = vsyncadd (%p86_p5), [#allocation9], 4294965760 }
  0x5f   : > { %2293 = dma.done.wait (%p86_p5), [#allocation12], 3072  }
  0x60   : > { %2295 = vsyncadd (%p86_p5), [#allocation12], 4294964224 }
  0x61   : > { %2297 = dma.done.wait (%p86_p5), [#allocation15], 1024  }
  0x62   : > { %2299 = vsyncadd (%p86_p5), [#allocation15], 4294966272  ;;  %s593_s14 = sand.u32 1, %s2314_s16  }
  0x63   : > { %s2687_s28 = sshll.u32 %s593_s14, 3 }
  0x64   : > { %s595_s21 = scalar_lea.vmem [#allocation16], %s2687_s28 }
  0x65   : > { %2301 = dma.done.wait (%p2597_p10), %s557_s4, 256  }
  0x66   : > { %2303 = vsyncadd (%p2597_p10), %s557_s4, 4294967040  ;;  %s2834_s29 = sld [smem:[#allocation28_spill]]  ;;  %s2361_s20 = smov 0.0   ;;  %v2697_v0 = vld [vmem:[%s560_s15] sm:$0xf] }
  0x67   : > { %s2835_s0 = sld [smem:[#allocation27_spill]]  ;;  %v1512_v1 = vld [vmem:[%s560_s15] sm:$0xf]  ;;  %v2699_v2 = vld [vmem:[%s560_s15] sm:$0xf0]  ;;  %s605_s6 = scalar_lea.vmem [#allocation17], %s2687_s28 }
  0x68   : > { %v1725_v3 = vld [vmem:[%s560_s15] sm:$0xf0] }
  0x6c   : > { %p665_p7 = scmp.eq.s32.totalorder %s2834_s29, 0  ;;  %p1509_p5 = scmp.ne.s32.totalorder %s2834_s29, 0 }
  0x6d   : > { %p666_p8 = scmp.eq.s32.totalorder %s2835_s0, 0  ;;  %s1508_s9 = sshll.u32 %s2835_s0, 4 }
  0x6e   : > { %677 = sbr.rel (%p1509_p5) target bundleno = 408 (0x198), region = 116  ;;  %s2837_s7 = sld [smem:[#allocation35_spill]] (!%p1509_p5) }
  0x6f   : > { %p667_p11 = pnand %p666_p8, %p665_p7  ;;  %s820_s13 = sshra.s32 (!%p1509_p5), %s1508_s9, 3 }
  0x70   : > { %s1563_s2 = sshll.u32 (!%p1509_p5), %s820_s13, 2 }
  0x71   : > { %1818 = sst [smem:[#allocation3]] (!%p667_p11), %s2361_s20  ;;  %s823_s5 = scalar_lea.vmem (!%p1509_p5), [#allocation2], %s1563_s2 }
  0x72   : > { %1819 = sst [smem:[#allocation3 + $0x1]] (!%p667_p11), %s2361_s20 }
  0x73   : > { %v1729_v4 = vld [vmem:[#allocation8 + $0x18] sm:$0xff]  ;;  %v1728_v6 = vld [vmem:[#allocation8 + $0x10] sm:$0xff]  ;;  %v1727_v8 = vld [vmem:[#allocation8 + $0x8] sm:$0xff]  ;;  %v1513_v12 = vor.u32 %v1725_v3, %v1512_v1  ;;  %vm719_vm0 = vcmask 523264  }
  0x74   : > { %v1737_v5 = vld [vmem:[#allocation10 + $0x38] sm:$0xff]  ;;  %727 = vmatpush.bf16.msra.mxu0 %v1729_v4  ;;  %v1736_v7 = vld [vmem:[#allocation10 + $0x30] sm:$0xff]  ;;  %v1735_v9 = vld [vmem:[#allocation10 + $0x28] sm:$0xff] }
  0x75   : > { %804 = vmatpush.bf16.msra.mxu1 %v1737_v5  ;;  %v1726_v10 = vld [vmem:[#allocation8] sm:$0xff]  ;;  %v1733_v13 = vld [vmem:[#allocation10 + $0x18] sm:$0xff]  ;;  %v1732_v14 = vld [vmem:[#allocation10 + $0x10] sm:$0xff] }
  0x76   : > { %v1734_v11 = vld [vmem:[#allocation10 + $0x20] sm:$0xff]  ;;  %v1731_v15 = vld [vmem:[#allocation10 + $0x8] sm:$0xff]  ;;  %v1966_v18 = vld [vmem:[%s2837_s7] ss:$0 sm:$0xff] }
  0x77   : > { %v1730_v16 = vld [vmem:[#allocation10] sm:$0xff] }
  0x78   : > { %728 = vmatpush.bf16.msra.mxu0 %v1728_v6 }
  0x79   : > { %805 = vmatpush.bf16.msra.mxu1 %v1736_v7 }
  0x7c   : > { %729 = vmatpush.bf16.msra.mxu0 %v1727_v8 }
  0x7d   : > { %806 = vmatpush.bf16.msra.mxu1 %v1735_v9 }
  0x80   : > { %730 = vmatpush.bf16.msra.mxu0 %v1726_v10 }
  0x81   : > { %807 = vmatpush.bf16.msra.mxu1 %v1734_v11 }
  0x83   : > { %1530 = vmatmul.msk.bf16.vlgmr.msra.gmra.mxu0 %vm719_vm0, %v1513_v12 }
  0x85   : > { %808 = vmatpush.bf16.msra.mxu1 %v1733_v13 }
  0x89   : > { %809 = vmatpush.bf16.msra.mxu1 %v1732_v14 }
  0x8d   : > { %810 = vmatpush.bf16.msra.mxu1 %v1731_v15 }
  0x91   : > { %811 = vmatpush.bf16.msra.mxu1 %v1730_v16 }
 0x100   : > { %v732_v17 = vpop.f32.mrf.mxu0 }
 0x101   : > { %v733_v19 = vadd.f32 %v1966_v18, %v732_v17 }
 0x103   : > { %v737_v22 = vmax.f32 %v733_v19, 0.0 }
 0x108   : > { %v734_v20 = vpop.f32.mrf.mxu0 }
 0x109   : > { %v735_v21 = vadd.f32 %v1966_v18, %v734_v20 }
 0x10b   : > { %v738_v23 = vmax.f32 %v735_v21, 0.0 }
 0x10d   : > { %v739_v24 = vpack.c.bf16 %v738_v23, %v737_v22 }
 0x10f   : > { %812 = vmatmul.bf16.vlgmr.msra.gmra.mxu1 %v739_v24 }
 0x18c   : > { %v813_v25 = vpop.f32.mrf.mxu1 }
 0x194   : > { %v815_v26 = vpop.f32.mrf.mxu1 }
 0x195   : > { %v1777_v27 = vpack.c.bf16 %v815_v26, %v813_v25 }
 0x197   : > { %1778 = vst [vmem:[%s823_s5] sm:$0xff] %v1777_v27  }
 0x198 PF: > { %s2838_s3 = sld [smem:[#allocation28_spill]] }
 0x19e   : > { %p1564_p12 = scmp.ne.s32.totalorder %s2838_s3, 1 }
 0x19f   : > { %s2839_s12 = sld [smem:[#allocation36_spill]] (!%p1564_p12) }
 0x1a0   : > { %829 = sbr.rel (%p1564_p12) target bundleno = 1315 (0x523), region = 120  ;;  %s2840_s4 = sld [smem:[#allocation38_spill]] (!%p1564_p12) }
 0x1a1   : > { %s2841_s29 = sld [smem:[#allocation41_spill]] (!%p1564_p12) }
 0x1a2   : > { %s2842_s20 = sld [smem:[#allocation40_spill]] (!%p1564_p12) }
 0x1a3   : > { %s2843_s28 = sld [smem:[#allocation27_spill]] (!%p1564_p12) }
 0x1a4   : > { %s1314_s27 = sld [smem:[#allocation4]] (!%p1564_p12) }
 0x1a5   : > { %v1741_v28 = vld [vmem:[#allocation2 + $0x18] sm:$0xff]  ;;  %v1740_v29 = vld [vmem:[#allocation2 + $0x10] sm:$0xff]  ;;  %v1644_v30 = vld [vmem:[#allocation11 + $0x70] sm:$0xf]  ;;  %v1568_v55 = vor.u32 %v2699_v2, %v2697_v0  ;;  %vm871_vm1 = vcmask 523264   ;;  %vm1277_vm2 = vcmask 7168  }
 0x1a6   : > { %v1757_v31 = vld [vmem:[#allocation11 + $0x74] sm:$0xf0]  ;;  %879 = vmatpush.bf16.msra.mxu0 %v1741_v28  ;;  %v1756_v33 = vld [vmem:[#allocation11 + $0x74] sm:$0xf]  ;;  %v1646_v34 = vld [vmem:[#allocation11 + $0x78] sm:$0xf0] }
 0x1a7   : > { %v1645_v32 = vor.u32 %v1757_v31, %v1644_v30  ;;  %v1636_v35 = vld [vmem:[#allocation11 + $0x60] sm:$0xf]  ;;  %v1649_v36 = vor.u32 %v1756_v33, %v1646_v34  ;;  %v1755_v37 = vld [vmem:[#allocation11 + $0x64] sm:$0xf0]  ;;  %v1754_v38 = vld [vmem:[#allocation11 + $0x64] sm:$0xf] }
 0x1a8   : > { %v1638_v39 = vld [vmem:[#allocation11 + $0x68] sm:$0xf0]  ;;  %v1637_v40 = vor.u32 %v1755_v37, %v1636_v35  ;;  %v1628_v42 = vld [vmem:[#allocation11 + $0x50] sm:$0xf]  ;;  %v1753_v43 = vld [vmem:[#allocation11 + $0x54] sm:$0xf0] }
 0x1a9   : > { %992 = vmatpush.bf16.msra.mxu1 %v1645_v32  ;;  %1006 = vmatpush.bf16.msra.mxu2 %v1649_v36  ;;  %v1641_v41 = vor.u32 %v1754_v38, %v1638_v39  ;;  %v1739_v44 = vld [vmem:[#allocation2 + $0x8] sm:$0xff]  ;;  %v1752_v45 = vld [vmem:[#allocation11 + $0x54] sm:$0xf]  ;;  %v1629_v47 = vor.u32 %v1753_v43, %v1628_v42  ;;  %v1620_v49 = vld [vmem:[#allocation11 + $0x40] sm:$0xf]  ;;  %p1864_p13 = scmp.eq.s32.totalorder %s2843_s28, 3 }
 0x1aa   : > { %880 = vmatpush.bf16.msra.mxu0 %v1740_v29  ;;  %v1630_v46 = vld [vmem:[#allocation11 + $0x58] sm:$0xf0]  ;;  %v1751_v50 = vld [vmem:[#allocation11 + $0x44] sm:$0xf0]  ;;  %v1738_v51 = vld [vmem:[#allocation2] sm:$0xff] }
 0x1ab   : > { %v1633_v48 = vor.u32 %v1752_v45, %v1630_v46  ;;  %v1750_v52 = vld [vmem:[#allocation11 + $0x44] sm:$0xf]  ;;  %v1622_v53 = vld [vmem:[#allocation11 + $0x48] sm:$0xf0]  ;;  %v1621_v54 = vor.u32 %v1751_v50, %v1620_v49  ;;  %v1612_v57 = vld [vmem:[#allocation11 + $0x30] sm:$0xf] }
 0x1ac   : > { %v1625_v56 = vor.u32 %v1750_v52, %v1622_v53  ;;  %v1749_v58 = vld [vmem:[#allocation11 + $0x34] sm:$0xf0]  ;;  %v1748_v59 = vld [vmem:[#allocation11 + $0x34] sm:$0xf]  ;;  %v1614_v60 = vld [vmem:[#allocation11 + $0x38] sm:$0xf0] }
 0x1ad   : > { %993 = vmatpush.bf16.msra.mxu1 %v1637_v40  ;;  %1007 = vmatpush.bf16.msra.mxu2 %v1641_v41  ;;  %v1613_v61 = vor.u32 %v1749_v58, %v1612_v57  ;;  %v1617_v62 = vor.u32 %v1748_v59, %v1614_v60  ;;  %v1604_v63 = vld [vmem:[#allocation11 + $0x20] sm:$0xf]  ;;  %v1747_v1 = vld [vmem:[#allocation11 + $0x24] sm:$0xf0]  ;;  %v1746_v3 = vld [vmem:[#allocation11 + $0x24] sm:$0xf] }
 0x1ae   : > { %881 = vmatpush.bf16.msra.mxu0 %v1739_v44  ;;  %v1605_v4 = vor.u32 %v1747_v1, %v1604_v63  ;;  %v1606_v0 = vld [vmem:[#allocation11 + $0x28] sm:$0xf0]  ;;  %v1596_v5 = vld [vmem:[#allocation11 + $0x10] sm:$0xf]  ;;  %v1745_v6 = vld [vmem:[#allocation11 + $0x14] sm:$0xf0] }
 0x1af   : > { %v1609_v2 = vor.u32 %v1746_v3, %v1606_v0  ;;  %v1744_v7 = vld [vmem:[#allocation11 + $0x14] sm:$0xf]  ;;  %v1597_v8 = vor.u32 %v1745_v6, %v1596_v5  ;;  %v1598_v9 = vld [vmem:[#allocation11 + $0x18] sm:$0xf0]  ;;  %v1588_v11 = vld [vmem:[#allocation11] sm:$0xf] }
 0x1b0   : > { %v1601_v10 = vor.u32 %v1744_v7, %v1598_v9  ;;  %v1743_v12 = vld [vmem:[#allocation11 + $0x4] sm:$0xf0]  ;;  %v1742_v13 = vld [vmem:[#allocation11 + $0x4] sm:$0xf]  ;;  %v1590_v15 = vld [vmem:[#allocation11 + $0x8] sm:$0xf0] }
 0x1b1   : > { %994 = vmatpush.bf16.msra.mxu1 %v1629_v47  ;;  %1008 = vmatpush.bf16.msra.mxu2 %v1633_v48  ;;  %v1589_v14 = vor.u32 %v1743_v12, %v1588_v11  ;;  %v1593_v16 = vor.u32 %v1742_v13, %v1590_v15  ;;  %v1765_v17 = vld [vmem:[#allocation13 + $0x38] sm:$0xff]  ;;  %v1764_v19 = vld [vmem:[#allocation13 + $0x30] sm:$0xff]  ;;  %v1763_v27 = vld [vmem:[#allocation13 + $0x28] sm:$0xff] }
 0x1b2   : > { %882 = vmatpush.bf16.msra.mxu0 %v1738_v51  ;;  %v1773_v18 = vld [vmem:[#allocation14 + $0x38] sm:$0xff]  ;;  %1100 = vmatpush.bf16.msra.mxu3 %v1765_v17  ;;  %v1772_v20 = vld [vmem:[#allocation14 + $0x30] sm:$0xff]  ;;  %v1771_v28 = vld [vmem:[#allocation14 + $0x28] sm:$0xff] }
 0x1b3   : > { %v1967_v22 = vld [vmem:[%s2839_s12] ss:$0 sm:$0xff]  ;;  %v1762_v29 = vld [vmem:[#allocation13 + $0x20] sm:$0xff]  ;;  %v1761_v31 = vld [vmem:[#allocation13 + $0x18] sm:$0xff] }
 0x1b4   : > { %v1770_v30 = vld [vmem:[#allocation14 + $0x20] sm:$0xff]  ;;  %v1769_v32 = vld [vmem:[#allocation14 + $0x18] sm:$0xff]  ;;  %v1760_v33 = vld [vmem:[#allocation13 + $0x10] sm:$0xff] }
 0x1b5   : > { %995 = vmatpush.bf16.msra.mxu1 %v1621_v54  ;;  %1585 = vmatmul.msk.bf16.vlgmr.msra.gmra.mxu0 %vm871_vm1, %v1568_v55  ;;  %v1768_v34 = vld [vmem:[#allocation14 + $0x10] sm:$0xff]  ;;  %v1759_v35 = vld [vmem:[#allocation13 + $0x8] sm:$0xff]  ;;  %v1758_v37 = vld [vmem:[#allocation13] sm:$0xff] }
 0x1b6   : > { %1009 = vmatpush.bf16.msra.mxu2 %v1625_v56  ;;  %1186 = vmatpush.bf16.msrb.mxu0 %v1773_v18  ;;  %v1767_v36 = vld [vmem:[#allocation14 + $0x8] sm:$0xff]  ;;  %v1766_v38 = vld [vmem:[#allocation14] sm:$0xff]  ;;  %v906_v40 = vld [vmem:[%s2840_s4] sm:$0x3] }
 0x1b7   : > { %1101 = vmatpush.bf16.msra.mxu3 %v1764_v19  ;;  %v909_v41 = vperm.slane %v906_v40, 1  ;;  %v908_v43 = vperm.slane %v906_v40, 0  ;;  %v1968_v1 = vld [vmem:[%s2841_s29] ss:$0 sm:$0xff] }
 0x1b8   : > { %v1969_v0 = vld [vmem:[%s2842_s20] ss:$0 sm:$0xff] }
 0x1b9   : > { %996 = vmatpush.bf16.msra.mxu1 %v1613_v61 }
 0x1ba   : > { %1010 = vmatpush.bf16.msra.mxu2 %v1617_v62  ;;  %1187 = vmatpush.bf16.msrb.mxu0 %v1772_v20  ;;  %v1780_v62 = vld [vmem:[%s595_s21] sm:$0xff]   ;;  %s1276_s21 = sld [smem:[#allocation3]] }
 0x1bb   : > { %1102 = vmatpush.bf16.msra.mxu3 %v1763_v27  ;;  %v1781_v63 = vunpack.c.l.bf16 %v1780_v62  ;;  %v1784_v27 = vld [vmem:[%s605_s6] sm:$0xff]   ;;  %s1714_s6 = sld [smem:[#allocation3 + $0x1]] }
 0x1bd   : > { %997 = vmatpush.bf16.msra.mxu1 %v1605_v4  ;;  %1224 = vadd.xlane.f32.xlu2 %v1781_v63 }
 0x1be   : > { %1011 = vmatpush.bf16.msra.mxu2 %v1609_v2  ;;  %1188 = vmatpush.bf16.msrb.mxu0 %v1771_v28  ;;  %v1786_v28 = vunpack.c.h.bf16 %v1784_v27 }
 0x1bf   : > { %1103 = vmatpush.bf16.msra.mxu3 %v1762_v29 }
 0x1c1   : > { %998 = vmatpush.bf16.msra.mxu1 %v1597_v8 }
 0x1c2   : > { %1012 = vmatpush.bf16.msra.mxu2 %v1601_v10  ;;  %1189 = vmatpush.bf16.msrb.mxu0 %v1770_v30  ;;  %v1782_v10 = vunpack.c.h.bf16 %v1780_v62  ;;  %v1785_v30 = vunpack.c.l.bf16 %v1784_v27 }
 0x1c3   : > { %1104 = vmatpush.bf16.msra.mxu3 %v1761_v31 }
 0x1c5   : > { %999 = vmatpush.bf16.msra.mxu1 %v1589_v14 }
 0x1c6   : > { %1013 = vmatpush.bf16.msra.mxu2 %v1593_v16  ;;  %1190 = vmatpush.bf16.msrb.mxu0 %v1769_v32 }
 0x1c7   : > { %1105 = vmatpush.bf16.msra.mxu3 %v1760_v33 }
 0x1ca   : > { %1191 = vmatpush.bf16.msrb.mxu0 %v1768_v34 }
 0x1cb   : > { %1106 = vmatpush.bf16.msra.mxu3 %v1759_v35 }
 0x1ce   : > { %1192 = vmatpush.bf16.msrb.mxu0 %v1767_v36 }
 0x1cf   : > { %1107 = vmatpush.bf16.msra.mxu3 %v1758_v37 }
 0x1d2   : > { %1193 = vmatpush.bf16.msrb.mxu0 %v1766_v38 }
 0x230   : > { %v1225_v34 = vpop.xlane.xlu2 %1224 }
 0x232   : > { %v884_v21 = vpop.f32.mrf.mxu0 }
 0x233   : > { %v885_v24 = vadd.f32 %v1967_v22, %v884_v21 }
 0x23a   : > { %v886_v23 = vpop.f32.mrf.mxu0 }
 0x23b   : > { %v887_v25 = vadd.f32 %v1967_v22, %v886_v23 }
 0x23d   : > { %v889_v26 = vpack.c.bf16 %v887_v25, %v885_v24 }
 0x23f   : > { %1000 = vmatmul.bf16.vlgmr.msra.gmra.mxu1 %v889_v26  ;;  %1014 = vmatmul.bf16.vlgmr.msra.gmra.mxu2 %v889_v26 }
 0x2bc   : > { %v1001_v39 = vpop.f32.mrf.mxu1 }
 0x2bd   : > { %v1002_v46 = vadd.f32 %v1001_v39, %v908_v43 }
 0x2bf   : > { %v1020_v50 = vmax.f32 %v1002_v46, 0.0 }
 0x2c2   : > { %v1015_v42 = vpop.f32.mrf.mxu2 }
 0x2c3   : > { %v1016_v44 = vadd.f32 %v1015_v42, %v909_v41 }
 0x2c4   : > { %v1003_v45 = vpop.f32.mrf.mxu1 }
 0x2c5   : > { %v1021_v47 = vmax.f32 %v1016_v44, 0.0  ;;  %v1004_v48 = vadd.f32 %v1003_v45, %v908_v43 }
 0x2c7   : > { %v1024_v52 = vpack.c.bf16 %v1021_v47, %v1020_v50  ;;  %v1022_v53 = vmax.f32 %v1004_v48, 0.0 }
 0x2c9   : > { %v1134_v56 = vunpack.c.h.b16 %v1024_v52  ;;  %v1048_v58 = vunpack.c.l.b16 %v1024_v52 }
 0x2ca   : > { %v1017_v49 = vpop.f32.mrf.mxu2 }
 0x2cb   : > { %v1018_v51 = vadd.f32 %v1017_v49, %v909_v41 }
 0x2cd   : > { %v1023_v54 = vmax.f32 %v1018_v51, 0.0 }
 0x2cf   : > { %v1025_v55 = vpack.c.bf16 %v1023_v54, %v1022_v53 }
 0x2d1   : > { %v1135_v57 = vunpack.c.h.b16 %v1025_v55  ;;  %v1049_v59 = vunpack.c.l.b16 %v1025_v55 }
 0x2d3   : > { %v1050_v60 = vpack.c.b16 %v1049_v59, %v1048_v58  ;;  %v1136_v61 = vpack.c.b16 %v1135_v57, %v1134_v56 }
 0x2d5   : > { %1108 = vmatmul.bf16.vlgmr.msra.gmra.mxu3 %v1050_v60  ;;  %1194 = vmatmul.bf16.vlgmr.msrb.gmra.mxu0 %v1136_v61 }
 0x352   : > { %v1195_v3 = vpop.f32.mrf.mxu0 }
 0x353   : > { %v1196_v4 = vadd.f32 %v1968_v1, %v1195_v3 }
 0x355   : > { %1242 = vmax.xlane.f32.xlu1 %v1196_v4  ;;  %v1266_v33 = vmul.f32 %v1785_v30, %v1196_v4 }
 0x358   : > { %v1109_v2 = vpop.f32.mrf.mxu3 }
 0x359   : > { %v1110_v5 = vadd.f32 %v1969_v0, %v1109_v2 }
 0x35a   : > { %v1197_v6 = vpop.f32.mrf.mxu0 }
 0x35b   : > { %v1198_v7 = vadd.f32 %v1968_v1, %v1197_v6  ;;  %1204 = vmax.xlane.f32.xlu0 %v1110_v5  ;;  %v1228_v25 = vmul.f32 %v1781_v63, %v1110_v5 }
 0x35d   : > { %1244 = vmax.xlane.f32.xlu1 %v1198_v7  ;;  %v1267_v31 = vmul.f32 %v1786_v28, %v1198_v7 }
 0x360   : > { %v1111_v8 = vpop.f32.mrf.mxu3 }
 0x361   : > { %v1112_v9 = vadd.f32 %v1969_v0, %v1111_v8 }
 0x363   : > { %1206 = vmax.xlane.f32.xlu0 %v1112_v9  ;;  %v1229_v32 = vmul.f32 %v1782_v10, %v1112_v9 }
 0x36b   : > { %1226 = vadd.xlane.f32.xlu0 %v1782_v10 }
 0x3c8   : > { %v2725_v11 = vpop.xlane.xlu1 %1242 }
 0x3c9   : > { %v1246_v12 = vsub.f32 %v1196_v4, %v2725_v11 }
 0x3cb   : > { %v1248_v13 = vmul.f32 1.442695, %v1246_v12 }
 0x3cd   : > { %1970 = vpow2.f32 %v1248_v13 }
 0x3ce   : > { %v1205_v14 = vpop.xlane.xlu0 %1204 }
 0x3cf   : > { %v1208_v15 = vsub.f32 %v1110_v5, %v1205_v14 }
 0x3d0   : > { %v1245_v16 = vpop.xlane.xlu1 %1244 }
 0x3d1   : > { %v1210_v17 = vmul.f32 1.442695, %v1208_v15  ;;  %v1247_v18 = vsub.f32 %v1198_v7, %v1245_v16 }
 0x3d3   : > { %v1971_v19 = vpop.eup %1970  ;;  %1972 = vpow2.f32 %v1210_v17  ;;  %v1250_v20 = vmul.f32 1.442695, %v1247_v18 }
 0x3d4   : > { %1252 = vadd.xlane.f32.xlu0 %v1971_v19 }
 0x3d5   : > { %1974 = vpow2.f32 %v1250_v20 }
 0x3d6   : > { %v1207_v21 = vpop.xlane.xlu0 %1206 }
 0x3d7   : > { %v1209_v22 = vsub.f32 %v1112_v9, %v1207_v21 }
 0x3d9   : > { %v1973_v23 = vpop.eup %1972  ;;  %v1212_v24 = vmul.f32 1.442695, %v1209_v22 }
 0x3da   : > { %1214 = vadd.xlane.f32.xlu2 %v1973_v23 }
 0x3db   : > { %v1975_v26 = vpop.eup %1974  ;;  %1976 = vpow2.f32 %v1212_v24 }
 0x3dc   : > { %1254 = vadd.xlane.f32.xlu1 %v1975_v26  ;;  %1230 = vadd.xlane.f32.xlu0 %v1228_v25 }
 0x3de   : > { %v1227_v35 = vpop.xlane.xlu0 %1226 }
 0x3e1   : > { %v1977_v29 = vpop.eup %1976 }
 0x3e2   : > { %1216 = vadd.xlane.f32.xlu2 %v1977_v29 }
 0x3e4   : > { %1262 = vadd.xlane.f32.xlu1 %v1785_v30  ;;  %1270 = vadd.xlane.f32.xlu0 %v1267_v31 }
 0x3ea   : > { %1264 = vadd.xlane.f32.xlu2 %v1786_v28 }
 0x3ec   : > { %1232 = vadd.xlane.f32.xlu1 %v1229_v32 }
 0x3f2   : > { %1268 = vadd.xlane.f32.xlu2 %v1266_v33 }
 0x447   : > { %v1253_v37 = vpop.xlane.xlu0 %1252 }
 0x44d   : > { %v1215_v36 = vpop.xlane.xlu2 %1214 }
 0x44e   : > { %1978 = vlog2.f32 %v1215_v36 }
 0x44f   : > { %v1255_v38 = vpop.xlane.xlu1 %1254  ;;  %v1231_v45 = vpop.xlane.xlu0 %1230 }
 0x450   : > { %1980 = vlog2.f32 %v1255_v38 }
 0x451   : > { %1982 = vlog2.f32 %v1253_v37 }
 0x454   : > { %v1979_v39 = vpop.eup %1978 }
 0x455   : > { %v1219_v40 = vmul.f32 0.6931472, %v1979_v39  ;;  %v1217_v41 = vpop.xlane.xlu2 %1216 }
 0x456   : > { %1984 = vlog2.f32 %v1217_v41  ;;  %v1981_v42 = vpop.eup %1980 }
 0x457   : > { %v1263_v43 = vpop.xlane.xlu1 %1262  ;;  %v1222_v44 = vadd.f32 %v1219_v40, %v1205_v14  ;;  %v1259_v46 = vmul.f32 0.6931472, %v1981_v42  ;;  %v1983_v47 = vpop.eup %1982 }
 0x458   : > { %v1257_v52 = vmul.f32 0.6931472, %v1983_v47  ;;  %v1271_v60 = vpop.xlane.xlu0 %1270 }
 0x459   : > { %v1234_v49 = vmul.f32 %v1225_v34, %v1222_v44  ;;  %v1261_v53 = vadd.f32 %v1259_v46, %v1245_v16 }
 0x45a   : > { %v1260_v58 = vadd.f32 %v1257_v52, %v2725_v11 }
 0x45b   : > { %v1236_v56 = vsub.f32 %v1234_v49, %v1231_v45 }
 0x45c   : > { %v1985_v48 = vpop.eup %1984  ;;  %v1272_v62 = vmul.f32 %v1263_v43, %v1260_v58 }
 0x45d   : > { %v1221_v50 = vmul.f32 0.6931472, %v1985_v48  ;;  %v1265_v51 = vpop.xlane.xlu2 %1264  ;;  %v1294_v3 = vsel %vm1277_vm2, %v1236_v56, 0.0 }
 0x45e   : > { %v1273_v55 = vmul.f32 %v1265_v51, %v1261_v53 }
 0x45f   : > { %v1223_v54 = vadd.f32 %v1221_v50, %v1207_v21  ;;  %v1233_v59 = vpop.xlane.xlu1 %1232 }
 0x460   : > { %v1275_v63 = vsub.f32 %v1273_v55, %v1271_v60 }
 0x461   : > { %v1235_v57 = vmul.f32 %v1227_v35, %v1223_v54 }
 0x462   : > { %v1279_v6 = vsel %vm1277_vm2, %v1275_v63, 0.0 }
 0x463   : > { %v1237_v61 = vsub.f32 %v1235_v57, %v1233_v59 }
 0x465   : > { %v1269_v1 = vpop.xlane.xlu2 %1268  ;;  %v1295_v4 = vsel %vm1277_vm2, %v1237_v61, 0.0 }
 0x466   : > { %v1274_v0 = vsub.f32 %v1272_v62, %v1269_v1  ;;  %v1296_v2 = vadd.f32 %v1295_v4, %v1294_v3 }
 0x468   : > { %1297 = vadd.xlane.f32.xlu2 %v1296_v2  ;;  %v1278_v5 = vsel %vm1277_vm2, %v1274_v0, 0.0 }
 0x469   : > { %v1280_v7 = vadd.f32 %v1279_v6, %v1278_v5 }
 0x46b   : > { %1281 = vadd.xlane.f32.xlu1 %v1280_v7 }
 0x4db   : > { %v1298_v8 = vpop.xlane.xlu2 %1297 }
 0x4dc   : > { %v1299_v9 = vrot.slane %v1298_v8, 4 }
 0x4de   : > { %v1300_v10 = vadd.f32 %v1299_v9, %v1298_v8  ;;  %v1282_v11 = vpop.xlane.xlu1 %1281 }
 0x4df   : > { %v1283_v12 = vrot.slane %v1282_v11, 4 }
 0x4e0   : > { %v1301_v13 = vrot.slane %v1300_v10, 2 }
 0x4e1   : > { %v1284_v14 = vadd.f32 %v1283_v12, %v1282_v11 }
 0x4e2   : > { %v1302_v15 = vadd.f32 %v1301_v13, %v1300_v10 }
 0x4e3   : > { %v1285_v16 = vrot.slane %v1284_v14, 2 }
 0x4e4   : > { %v1303_v18 = vrot.slane %v1302_v15, 1 }
 0x4e5   : > { %v1286_v17 = vadd.f32 %v1285_v16, %v1284_v14 }
 0x4e6   : > { %v1304_v21 = vadd.f32 %v1303_v18, %v1302_v15 }
 0x4e7   : > { %v1287_v19 = vrot.slane %v1286_v17, 1 }
 0x4e9   : > { %v1288_v20 = vadd.f32 %v1287_v19, %v1286_v17 }
 0x4eb   : > { %1787 = vpush %v1288_v20 }
 0x4ec   : > { %1789 = vpush %v1304_v21 }
 0x51c   : > { %s1788_s11 = spop %1787 }
 0x51d   : > { %s1290_s30 = sadd.f32 %s1788_s11, %s1276_s21  ;;  %s1790_s7 = spop %1789 }
 0x51e   : > { %s1306_s13 = sadd.f32 %s1790_s7, %s1714_s6 }
 0x51f   : > { %1292 = sst [smem:[#allocation3]] %s1290_s30  ;;  %s1315_s2 = smul.f32 %s1314_s27, %s1290_s30 }
 0x520   : > { %1308 = sst [smem:[#allocation3 + $0x1]] %s1306_s13  ;;  %s1319_s5 = smul.f32 0.015625, %s1306_s13 }
 0x521   : > { %1821 = sst [smem:[#allocation18]] (%p1864_p13), %s1315_s2 }
 0x522   : > { %1822 = sst [smem:[#allocation18 + $0x1]] (%p1864_p13), %s1319_s5 }
 0x523 PF: > { %p1865_p1 = scmp.eq.s32.totalorder %s2495_s25, 7  ;;  %s2844_s8 = sld [smem:[#allocation44_spill]] }
 0x524   : > { %s2362_s18 = smov [#allocation18]  }
 0x529   : > { %s1328_s12 = sshll.u32 %s2844_s8, 4  ;;  %s1329_s12 = int_to_ptr.hbm [resolvable:$true] %s1328_s12 }
 0x52a   : > { %1824 = dma.smem_to_hbm (%p1865_p1), %s2362_s18, 16, %s1329_s12, [#allocation7]  }
 0x52b   : > { %2305 = dma.done.wait (%p1865_p1), [#allocation7], 16  }
 0x52c   : > { %2307 = vsyncadd (%p1865_p1), [#allocation7], 4294967280 }
 0x52d   : > { %1337 = sfence }
 0x52e PF: > { %s32_s24 = sadd.s32 1, %s2350_s24   ;;  %s2845_s18 = sld [smem:[#allocation25_spill]] }
 0x52f   : > { %p29_p3 = scmp.ge.s32.totalorder %s32_s24, 10   ;;  %s2846_s19 = sld [smem:[#allocation26_spill]] }
 0x530   : > { %s2847_s20 = sld [smem:[#allocation30_spill]]  ;;  %s2850_s15 = smov %s2314_s16 }
 0x531   : > { %s2848_s0 = sld [smem:[#allocation29_spill]]  ;;  %s2851_s16 = smov %s2318_s17 }
 0x532   : > { %s2849_s25 = sld [smem:[#allocation31_spill]]  ;;  %s2852_s17 = smov %s2614_s23 }
 0x533   : > { %s2853_s21 = smov %s2342_s22  ;;  %s2854_s22 = smov %s2857_s26 }
 0x534   :  { %31 = sbr.rel (!%p29_p3) target bundleno = 26 (0x1a), region = 178 }
 0x538   : > { %s2855_s23 = smov %s2849_s25 }
 0x539   :  { %1343 = vsyncpa [#allocation6], 1 }
 0x53a   :  { %1345 = vsyncpa [#allocation6 + $0x1], 1 }
 0x53b   :  { %1346 = vsyncpa [#allocation9], 1 }
 0x53c   :  { %1347 = vsyncpa [#allocation12], 1 }
 0x53d   :  { %1348 = vsyncpa [#allocation15], 1 }
 0x53e   :  { %1349 = vsyncpa [#allocation7], 1 }
 0x53f   :  { %1351 = vsyncpa [#allocation7 + $0x1], 1 }

</bundles_post_ra>
